<compile_context>
chip_gen: v5e
topology: v5e:2x2
jax: 0.10.0
libtpu: 0.0.40
codegen_flags: <defaults>
</compile_context>

<pallas_src>
import math

import jax
import jax.numpy as jnp
from jax import lax
from jax.experimental import pallas as pl
from jax.experimental.pallas import tpu as pltpu


# Above this (padded) vocab size the one-hot matmul is replaced by a true gather.
_ONEHOT_MAX_VOCAB = 2048


def _round_up(x: int, m: int) -> int:
    return ((x + m - 1) // m) * m


def _vmem_limit_bytes(need: int) -> int:
    # Explicit scoped-VMEM limit derived from the static footprint (2x headroom),
    # never below the 32 MiB default and capped under v7x's 64 MiB physical VMEM.
    return int(min(max(2 * need, 32 << 20), 64 << 20))


def _choose_tm(n_tokens, v_pad, d_pad, use_onehot, tm_max=256):
    """Row-tile size from a per-tile VMEM budget, with >=2 grid steps when possible."""
    budget = 8 << 20  # per-tile bytes; the rest of scoped VMEM is left for the table

    def tile_bytes(tm):
        b = 2 * tm * d_pad * 4 + 2 * tm * 4              # double-buffered out tile + ids
        if use_onehot:
            b += tm * v_pad * 8                           # one-hot + iota intermediates
        return b

    tm = tm_max
    while tm > 8 and tile_bytes(tm) > budget:
        tm //= 2
    if n_tokens > 8:                                      # v7x megacore: >= 2 grid steps
        tm = min(tm, _round_up((n_tokens + 1) // 2, 8))
    return max(8, min(tm, _round_up(n_tokens, 8)))


# ---------------------------------------------------------------------------
# Kernels
# ---------------------------------------------------------------------------
def _embed_onehot_kernel(ids_ref, table_ref, o_ref):
    """out = one_hot(ids) @ table — exact embedding gather on the MXU (small V)."""
    tm = ids_ref.shape[0]
    v = table_ref.shape[0]
    ids = ids_ref[...]                                            # (tm, 1) int32
    iota = lax.broadcasted_iota(jnp.int32, (tm, v), 1)
    one_hot = (ids == iota).astype(table_ref.dtype)               # exact 0/1
    o_ref[...] = jnp.dot(one_hot, table_ref[...],
                         preferred_element_type=jnp.float32).astype(o_ref.dtype)


def _embed_gather_kernel(ids_ref, table_ref, o_ref):
    """True row gather: ids live in SMEM (scalar prefetch), the table is
    VMEM-resident, and each token is one dynamically-sliced row copy.  No
    V-proportional FLOPs and no (tm, V) intermediates."""
    tm = o_ref.shape[0]
    base = pl.program_id(0) * tm

    def body(r, carry):
        idx = ids_ref[base + r]                                   # scalar SMEM read
        o_ref[pl.ds(r, 1), :] = table_ref[pl.ds(idx, 1), :]
        return carry

    lax.fori_loop(0, tm, body, 0, unroll=8)


# ---------------------------------------------------------------------------
# pallas_call wrappers
# ---------------------------------------------------------------------------
def _lookup_onehot(ids_col, table_pad, tm):
    n_pad = ids_col.shape[0]
    v_pad, d_pad = table_pad.shape
    itemsize = table_pad.dtype.itemsize
    need = (2 * v_pad * d_pad * itemsize        # resident table (double-buffered)
            + 2 * tm * d_pad * itemsize         # output tiles
            + tm * v_pad * (itemsize + 4))      # one-hot + iota intermediates
    return pl.pallas_call(
        _embed_onehot_kernel,
        out_shape=jax.ShapeDtypeStruct((n_pad, d_pad), table_pad.dtype),
        grid_spec=pltpu.PrefetchScalarGridSpec(
            num_scalar_prefetch=0,
            grid=(n_pad // tm,),
            in_specs=[
                pl.BlockSpec((tm, 1), lambda i: (i, 0)),          # token ids (column)
                pl.BlockSpec((v_pad, d_pad), lambda i: (0, 0)),   # table, VMEM-resident
            ],
            out_specs=pl.BlockSpec((tm, d_pad), lambda i: (i, 0)),
        ),
        compiler_params=pltpu.CompilerParams(
            dimension_semantics=("parallel",),
            vmem_limit_bytes=_vmem_limit_bytes(need),
        ),
    )(ids_col, table_pad)


def _lookup_gather(ids_1d, table_rows, tm):
    n_pad = ids_1d.shape[0]
    v_rows, d_cols = table_rows.shape
    itemsize = table_rows.dtype.itemsize
    need = 2 * v_rows * d_cols * itemsize + 2 * tm * d_cols * itemsize
    return pl.pallas_call(
        _embed_gather_kernel,
        out_shape=jax.ShapeDtypeStruct((n_pad, d_cols), table_rows.dtype),
        grid_spec=pltpu.PrefetchScalarGridSpec(
            num_scalar_prefetch=1,                                # ids -> SMEM
            grid=(n_pad // tm,),
            in_specs=[
                pl.BlockSpec((v_rows, d_cols), lambda i, ids: (0, 0)),
            ],
            out_specs=pl.BlockSpec((tm, d_cols), lambda i, ids: (i, 0)),
        ),
        compiler_params=pltpu.CompilerParams(
            dimension_semantics=("parallel",),
            vmem_limit_bytes=_vmem_limit_bytes(need),
        ),
    )(ids_1d, table_rows)


def embedding_lookup_pallas(ids_flat, table, *,
                            onehot_max_vocab=_ONEHOT_MAX_VOCAB, tm_max=256):
    """ids_flat: (N,) integer token ids in [0, V); table: (V, D) -> (N, D)."""
    n = ids_flat.shape[0]
    v, d = table.shape
    d_pad = _round_up(d, 256)                 # lane-dense feature dim (200 -> 256)
    v_pad = _round_up(v, 128)                 # lane / MXU-K aligned vocab
    use_onehot = v_pad <= onehot_max_vocab

    # NOTE: in a real pipeline the padded / uint32-packed table would be
    # prepared once and cached; it is rebuilt per call here to keep this
    # function self-contained.  Ids are assumed in range (word2idx guarantees
    # it); out-of-range ids are not bounds-checked by the gather path.
    table_pad = jnp.pad(table, ((0, v_pad - v), (0, d_pad - d)))

    tm = _choose_tm(n, v_pad, d_pad, use_onehot, tm_max)
    n_pad = _round_up(n, tm)
    ids = jnp.pad(ids_flat.astype(jnp.int32), (0, n_pad - n))    # pad id 0: always valid

    if use_onehot:
        out = _lookup_onehot(ids.reshape(n_pad, 1), table_pad, tm)
    elif table_pad.dtype.itemsize == 2:
        # Pack bf16 feature pairs into uint32 words so per-row dynamic slices
        # operate on an unpacked 32-bit layout (pure, exact bit movement).
        words = lax.bitcast_convert_type(
            table_pad.reshape(v_pad, d_pad // 2, 2), jnp.uint32)
        out_w = _lookup_gather(ids, words, tm)                    # (n_pad, d_pad//2) u32
        out = lax.bitcast_convert_type(out_w, table.dtype).reshape(n_pad, d_pad)
    else:
        out = _lookup_gather(ids, table_pad, tm)                  # 32-bit dtypes as-is

    return out[:n, :d]


# ---------------------------------------------------------------------------
# CustomTokens: host-side tokenization + Pallas-backed embedding
# ---------------------------------------------------------------------------
class CustomTokens:
    START, END, PAD, UNK = "<START>", "<END>", "<PAD>", "<UNK>"
    START_ID, END_ID, PAD_ID, UNK_ID = 0, 1, 2, 3

    def __init__(self, vocabulary, max_length, *, dim=200, seed=0,
                 table_dtype=jnp.bfloat16):
        self.vocab = list(vocabulary)
        self.dim = dim
        self.max_length = max_length

        self.idx2word = {i + 4: w for i, w in enumerate(self.vocab)}
        self.idx2word[self.START_ID] = self.START
        self.idx2word[self.END_ID] = self.END
        self.idx2word[self.PAD_ID] = self.PAD
        self.idx2word[self.UNK_ID] = self.UNK

        self.word2idx = {w: i + 4 for i, w in enumerate(self.vocab)}
        self.word2idx[self.START] = self.START_ID
        self.word2idx[self.END] = self.END_ID
        self.word2idx[self.PAD] = self.PAD_ID
        self.word2idx[self.UNK] = self.UNK_ID

        num = len(self.word2idx)
        # Xavier-uniform init, matching the no-glove branch of the module.
        # TODO(synk): load_glove() parses a GloVe text file (host I/O); not translated.
        bound = math.sqrt(6.0 / (num + dim))
        key = jax.random.PRNGKey(seed)
        table = jax.random.uniform(key, (num, dim), jnp.float32, -bound, bound)
        self.embeddings = table.astype(table_dtype)   # bf16 storage halves HBM/DMA bytes

        self._embed_fn = jax.jit(embedding_lookup_pallas)

    # -- host-side pieces of the module --------------------------------------
    def decode(self, x):
        return self.idx2word[int(x)]

    def _tokenize(self, sent):
        # TODO(synk): nltk.word_tokenize is host-side NLP with no Pallas
        #             equivalent; a simple whitespace tokenizer stands in.
        return sent.lower().split()

    def pad_sents(self, tokenized_sents):
        """Pads and tokenizes inputs (host-side, matches the PyTorch pad_sents)."""
        out = []
        for sent in tokenized_sents:
            tok = [self.PAD_ID] * self.max_length
            for i in range(self.max_length):
                if i >= len(sent):
                    break
                tok[i] = self.word2idx.get(sent[i], self.UNK_ID)
            out.append(tok)
        return jnp.asarray(out, dtype=jnp.int32)

    def forward(self, x):
        """Tokenizes a list of sentences -> (B, max_length) int32 token ids."""
        tokenized = [self._tokenize(s) for s in x]
        return self.pad_sents(tokenized)

    __call__ = forward

    # -- TPU piece: embedding lookup via the Pallas kernels -------------------
    def embed(self, token_ids):
        """token_ids: (B, L) int32 -> (B, L, dim) embeddings."""
        b, l = token_ids.shape
        out = self._embed_fn(token_ids.reshape(b * l), self.embeddings)
        return out.reshape(b, l, self.dim)


# ---------------------------------------------------------------------------
if __name__ == "__main__":
    # ---- 1) Small-vocab path (one-hot @ table on the MXU) -------------------
    # Stand-in vocabulary: the original comes from torch.load('./vocab.pth').
    # TODO(synk): vocab.pth loading is host file I/O; a built-in word list is
    #             used so the script is self-contained.
    vocab = [f"w{i:02d}" for i in range(60)]       # + 4 special tokens -> V = 64
    max_length = 40
    tok = CustomTokens(vocab, max_length=max_length, dim=200, seed=0)

    sentences = [
        "w00 w01 w02 totally_unknown w05",
        "w10 w11",
        "w07 w08 w09 w10 w11 w12 w13 w14",
        "missing words here w03",
        "w20 w21 w22 w23",
        "w55 w59 w00",
        "w30",
        "w40 w41 w42 w43 w44 w45",
    ]

    token_ids = tok.forward(sentences)             # host-side forward(): (8, 40) int32
    assert token_ids.shape == (len(sentences), max_length), token_ids.shape

    emb = jax.block_until_ready(tok.embed(token_ids))   # Pallas TPU kernel (one-hot path)
    ref = jnp.take(tok.embeddings, token_ids.reshape(-1), axis=0).reshape(
        len(sentences), max_length, tok.dim)
    assert emb.shape == (len(sentences), max_length, tok.dim), emb.shape
    assert emb.dtype == tok.embeddings.dtype
    assert jnp.array_equal(emb, ref), "one-hot path mismatch vs reference lookup"

    # ---- 2) Large-vocab path (true gather from the VMEM-resident table) -----
    key_t, key_i = jax.random.split(jax.random.PRNGKey(0))
    big_v, n_tok = 5000, 500
    big_table = jax.random.normal(key_t, (big_v, 200), jnp.float32).astype(jnp.bfloat16)
    big_ids = jax.random.randint(key_i, (n_tok,), 0, big_v, dtype=jnp.int32)

    got = jax.block_until_ready(jax.jit(embedding_lookup_pallas)(big_ids, big_table))
    want = jnp.take(big_table, big_ids, axis=0)
    assert got.shape == (n_tok, 200) and got.dtype == big_table.dtype
    assert jnp.array_equal(got, want), "gather path mismatch vs reference lookup"

    print("KERNEL_OK")
</pallas_src>

<mosaic_0001>
module attributes {stable_mosaic.version = 11 : i64} {
  func.func @_embed_onehot_kernel(%arg0: i32, %arg1: memref<160x1xi32, #tpu.memory_space<vmem>>, %arg2: memref<128x256xbf16, #tpu.memory_space<vmem>>, %arg3: memref<160x256xbf16, #tpu.memory_space<vmem>>) attributes {dimension_semantics = [#tpu.dimension_semantics<parallel>], iteration_bounds = array<i64: 2>, scalar_prefetch = 0 : i64, scratch_operands = 0 : i64, tpu.core_type = #tpu.core_type<tc>, window_params = [{transform_indices = @transform_0, window_bounds = array<i64: 160, 1>}, {pipeline_mode = #tpu.pipeline_mode<synchronous>, transform_indices = @transform_1, window_bounds = array<i64: 128, 256>}, {transform_indices = @transform_2, window_bounds = array<i64: 160, 256>}]} {
    %c0 = arith.constant 0 : index
    %c0_0 = arith.constant 0 : index
    %0 = vector.load %arg1[%c0, %c0_0] : memref<160x1xi32, #tpu.memory_space<vmem>>, vector<160x1xi32>
    %1 = tpu.iota {dimensions = array<i32: 1>} : vector<160x128xi32>
    %2 = vector.broadcast %0 : vector<160x1xi32> to vector<160x128xi32>
    %3 = arith.cmpi eq, %2, %1 : vector<160x128xi32>
    %4 = arith.extui %3 : vector<160x128xi1> to vector<160x128xi32>
    %5 = arith.sitofp %4 : vector<160x128xi32> to vector<160x128xf32>
    %6 = arith.truncf %5 : vector<160x128xf32> to vector<160x128xbf16>
    %c0_1 = arith.constant 0 : index
    %c0_2 = arith.constant 0 : index
    %7 = vector.load %arg2[%c0_1, %c0_2] : memref<128x256xbf16, #tpu.memory_space<vmem>>, vector<128x256xbf16>
    %cst = arith.constant dense<0.000000e+00> : vector<160x256xf32>
    %8 = tpu.matmul %6, %7, %cst {dimension_numbers = #tpu.dot_dimension_numbers<[1], [0], [0], [1], [0, 0, 1, 1], [], []>} : vector<160x128xbf16>, vector<128x256xbf16>, vector<160x256xf32> -> vector<160x256xf32>
    %9 = arith.truncf %8 : vector<160x256xf32> to vector<160x256xbf16>
    %c0_3 = arith.constant 0 : index
    %c0_4 = arith.constant 0 : index
    %10 = vector.load %arg3[%c0_3, %c0_4] : memref<160x256xbf16, #tpu.memory_space<vmem>>, vector<160x256xbf16>
    tpu.vector_store %arg3[%c0_3, %c0_4], %9 {strides = array<i32>} : memref<160x256xbf16, #tpu.memory_space<vmem>>, vector<160x256xbf16>,
    return
  }
  func.func @transform_0(%arg0: i32) -> (i32, i32) {
    %c0_i32 = arith.constant 0 : i32
    %c0_i32_0 = arith.constant 0 : i32
    return %arg0, %c0_i32 : i32, i32
  }
  func.func @transform_1(%arg0: i32) -> (i32, i32) {
    %c0_i32 = arith.constant 0 : i32
    %c0_i32_0 = arith.constant 0 : i32
    %c0_i32_1 = arith.constant 0 : i32
    return %c0_i32, %c0_i32_0 : i32, i32
  }
  func.func @transform_2(%arg0: i32) -> (i32, i32) {
    %c0_i32 = arith.constant 0 : i32
    %c0_i32_0 = arith.constant 0 : i32
    return %arg0, %c0_i32 : i32, i32
  }
}

</mosaic_0001>

<bundles_post_ra>
// kernel: embedding_lookup_pallas.1
= control target key start
LH: loop header
LB: loop body
LE: loop exit
PB: predicated region body
PF: predicated region fallthrough
CT: control target
= control target key end

     0   :  { %s818_s9 = smov 0   ;;  %s1004_s0 = inlined_call_operand.vmem [shape: s32[320,1], index: 0, kind: input, shape index: {}]   ;;  %s1005_s1 = inlined_call_operand.vmem [shape: bf16[128,256], index: 1, kind: input, shape index: {}]   ;;  %s1006_s2 = inlined_call_operand.vmem [shape: bf16[320,256], index: 2, kind: output, shape index: {}]  }
   0x1 LB: > { %s613_s10 = sadd.s32 4294967295, %s799_s9   ;;  %p617_p0 = scmp.ge.s32.totalorder %s799_s9, 1  ;;  %s799_s9 = sphi %s818_s9, %s12_s9  }
   0x2   : > { %p113_p1 = scmp.lt.s32.totalorder %s799_s9, 3 }
   0x4   : > { %p114_p2 = pnand %p617_p0, %p113_p1 }
   0x5   : > { %s136_s11 = smul.u32 (!%p114_p2), 20, %s613_s10 }
   0x6   : > { %117 = sbr.rel (%p114_p2) target bundleno = 347 (0x15b), region = 28 }
   0x7   : > { %p137_p3 = scmp.lt.s32.totalorder (!%p114_p2), %s136_s11, 39 }
   0xb   : > { %v801_v0 = vmov 0   ;;  %s1008_s11 = smov (!%p137_p3, %s136_s11), 39  ;;  %v699_v21 = vld [vmem:[%s1005_s1 + $0x70] sm:$0xf]  ;;  %v763_v22 = vld [vmem:[%s1005_s1 + $0x74] sm:$0xf0] }
   0xc   : > { %792 = vset.pattern.permute.xlu2 %v801_v0  ;;  %791 = vset.pattern.permute.xlu1 %v801_v0  ;;  %s618_s12 = sshll.u32 %s1008_s11, 3  ;;  %v762_v23 = vld [vmem:[%s1005_s1 + $0x74] sm:$0xf]  ;;  %v700_v24 = vor.u32 %v763_v22, %v699_v21  ;;  %v701_v25 = vld [vmem:[%s1005_s1 + $0x78] sm:$0xf0] }
   0xd   : > { %790 = vset.pattern.permute.xlu0 %v801_v0  ;;  %s834_s15 = scalar_lea.vmem %s1004_s0, %s618_s12  ;;  %v691_v26 = vld [vmem:[%s1005_s1 + $0x60] sm:$0xf]  ;;  %v761_v27 = vld [vmem:[%s1005_s1 + $0x64] sm:$0xf0]  ;;  %v704_v28 = vor.u32 %v762_v23, %v701_v25  ;;  %v760_v29 = vld [vmem:[%s1005_s1 + $0x64] sm:$0xf]  ;;  %s979_s4 = scalar_lea.vmem %s1006_s2, %s618_s12 }
   0xe   : > { %v161_v1 = vld [vmem:[%s834_s15 + $0x60] sm:$0xff]  ;;  %v159_v2 = vld [vmem:[%s834_s15 + $0x50] sm:$0xff]  ;;  %v162_v4 = vld [vmem:[%s834_s15 + $0x68] sm:$0xff]  ;;  %397 = vmatpush.bf16.msra.mxu0 %v700_v24  ;;  %764 = vmatpush.bf16.msra.mxu2 %v700_v24  ;;  %v692_v31 = vor.u32 %v761_v27, %v691_v26 }
   0xf   : > { %v149_v3 = vld [vmem:[%s834_s15] sm:$0xff]  ;;  %208 = vperm.xlu2 %792, %v161_v1   ;;  %202 = vperm.xlu0 %790, %v159_v2   ;;  %v160_v5 = vld [vmem:[%s834_s15 + $0x58] sm:$0xff]  ;;  %v150_v6 = vld [vmem:[%s834_s15 + $0x8] sm:$0xff] }
  0x10   : > { %172 = vperm.xlu1 %791, %v149_v3   ;;  %v163_v7 = vld [vmem:[%s834_s15 + $0x70] sm:$0xff]  ;;  %v152_v9 = vld [vmem:[%s834_s15 + $0x18] sm:$0xff]  ;;  %v154_v10 = vld [vmem:[%s834_s15 + $0x28] sm:$0xff]  ;;  %456 = vmatpush.bf16.msra.mxu1 %v704_v28 }
  0x11   : > { %v151_v8 = vld [vmem:[%s834_s15 + $0x10] sm:$0xff]  ;;  %v164_v11 = vld [vmem:[%s834_s15 + $0x78] sm:$0xff]  ;;  %v153_v12 = vld [vmem:[%s834_s15 + $0x20] sm:$0xff]  ;;  %772 = vmatpush.bf16.msra.mxu3 %v704_v28 }
  0x12   : > { %v155_v13 = vld [vmem:[%s834_s15 + $0x30] sm:$0xff]  ;;  %v165_v14 = vld [vmem:[%s834_s15 + $0x80] sm:$0xff]  ;;  %v166_v15 = vld [vmem:[%s834_s15 + $0x88] sm:$0xff]  ;;  %398 = vmatpush.bf16.msra.mxu0 %v692_v31  ;;  %765 = vmatpush.bf16.msra.mxu2 %v692_v31 }
  0x13   : > { %v168_v16 = vld [vmem:[%s834_s15 + $0x98] sm:$0xff]  ;;  %v167_v18 = vld [vmem:[%s834_s15 + $0x90] sm:$0xff]  ;;  %v157_v19 = vld [vmem:[%s834_s15 + $0x40] sm:$0xff] }
  0x14   : > { %v156_v17 = vld [vmem:[%s834_s15 + $0x38] sm:$0xff]  ;;  %v158_v20 = vld [vmem:[%s834_s15 + $0x48] sm:$0xff]  ;;  %v683_v33 = vld [vmem:[%s1005_s1 + $0x50] sm:$0xf] }
  0x15   : > { %v693_v30 = vld [vmem:[%s1005_s1 + $0x68] sm:$0xf0]  ;;  %v759_v34 = vld [vmem:[%s1005_s1 + $0x54] sm:$0xf0]  ;;  %v758_v35 = vld [vmem:[%s1005_s1 + $0x54] sm:$0xf] }
  0x16   : > { %v696_v32 = vor.u32 %v760_v29, %v693_v30  ;;  %v684_v36 = vor.u32 %v759_v34, %v683_v33  ;;  %v685_v37 = vld [vmem:[%s1005_s1 + $0x58] sm:$0xf0]  ;;  %v675_v38 = vld [vmem:[%s1005_s1 + $0x40] sm:$0xf]  ;;  %v757_v39 = vld [vmem:[%s1005_s1 + $0x44] sm:$0xf0] }
  0x17   : > { %211 = vperm.xlu2 %792, %v162_v4   ;;  %205 = vperm.xlu0 %790, %v160_v5   ;;  %v688_v40 = vor.u32 %v758_v35, %v685_v37  ;;  %v756_v41 = vld [vmem:[%s1005_s1 + $0x44] sm:$0xf]  ;;  %v677_v42 = vld [vmem:[%s1005_s1 + $0x48] sm:$0xf0]  ;;  %v676_v43 = vor.u32 %v757_v39, %v675_v38  ;;  %v667_v45 = vld [vmem:[%s1005_s1 + $0x30] sm:$0xf] }
  0x18   : > { %175 = vperm.xlu1 %791, %v150_v6   ;;  %457 = vmatpush.bf16.msra.mxu1 %v696_v32  ;;  %v680_v44 = vor.u32 %v756_v41, %v677_v42  ;;  %v755_v46 = vld [vmem:[%s1005_s1 + $0x34] sm:$0xf0]  ;;  %v754_v47 = vld [vmem:[%s1005_s1 + $0x34] sm:$0xf]  ;;  %v669_v49 = vld [vmem:[%s1005_s1 + $0x38] sm:$0xf0]  ;;  %v169_v6 = vlaneseq }
  0x19   : > { %773 = vmatpush.bf16.msra.mxu3 %v696_v32  ;;  %399 = vmatpush.bf16.msra.mxu0 %v684_v36  ;;  %v668_v48 = vor.u32 %v755_v46, %v667_v45  ;;  %v659_v50 = vld [vmem:[%s1005_s1 + $0x20] sm:$0xf]  ;;  %v753_v51 = vld [vmem:[%s1005_s1 + $0x24] sm:$0xf0]  ;;  %v672_v52 = vor.u32 %v754_v47, %v669_v49  ;;  %v752_v53 = vld [vmem:[%s1005_s1 + $0x24] sm:$0xf] }
  0x1a   : > { %766 = vmatpush.bf16.msra.mxu2 %v684_v36  ;;  %v661_v54 = vld [vmem:[%s1005_s1 + $0x28] sm:$0xf0]  ;;  %v660_v55 = vor.u32 %v753_v51, %v659_v50  ;;  %v651_v57 = vld [vmem:[%s1005_s1 + $0x10] sm:$0xf]  ;;  %v751_v58 = vld [vmem:[%s1005_s1 + $0x14] sm:$0xf0] }
  0x1b   : > { %v664_v56 = vor.u32 %v752_v53, %v661_v54  ;;  %v750_v59 = vld [vmem:[%s1005_s1 + $0x14] sm:$0xf]  ;;  %v652_v60 = vor.u32 %v751_v58, %v651_v57  ;;  %v653_v61 = vld [vmem:[%s1005_s1 + $0x18] sm:$0xf0]  ;;  %v643_v62 = vld [vmem:[%s1005_s1] sm:$0xf] }
  0x1c   : > { %458 = vmatpush.bf16.msra.mxu1 %v688_v40  ;;  %v749_v63 = vld [vmem:[%s1005_s1 + $0x4] sm:$0xf0]  ;;  %v656_v0 = vor.u32 %v750_v59, %v653_v61  ;;  %v748_v1 = vld [vmem:[%s1005_s1 + $0x4] sm:$0xf]  ;;  %v645_v2 = vld [vmem:[%s1005_s1 + $0x8] sm:$0xf0] }
  0x1d   : > { %774 = vmatpush.bf16.msra.mxu3 %v688_v40  ;;  %400 = vmatpush.bf16.msra.mxu0 %v676_v43  ;;  %v644_v3 = vor.u32 %v749_v63, %v643_v62  ;;  %v648_v4 = vor.u32 %v748_v1, %v645_v2 }
  0x1e   : > { %767 = vmatpush.bf16.msra.mxu2 %v676_v43 }
  0x1f   : > { %214 = vperm.xlu2 %792, %v163_v7   ;;  %178 = vperm.xlu0 %790, %v151_v8   ;;  %v952_v8 = vand.u32 127, %v169_v6 }
  0x20   : > { %181 = vperm.xlu1 %791, %v152_v9   ;;  %459 = vmatpush.bf16.msra.mxu1 %v680_v44 }
  0x21   : > { %775 = vmatpush.bf16.msra.mxu3 %v680_v44  ;;  %401 = vmatpush.bf16.msra.mxu0 %v668_v48 }
  0x22   : > { %768 = vmatpush.bf16.msra.mxu2 %v668_v48 }
  0x24   : > { %460 = vmatpush.bf16.msra.mxu1 %v672_v52 }
  0x25   : > { %776 = vmatpush.bf16.msra.mxu3 %v672_v52  ;;  %402 = vmatpush.bf16.msra.mxu0 %v660_v55 }
  0x26   : > { %769 = vmatpush.bf16.msra.mxu2 %v660_v55 }
  0x27   : > { %187 = vperm.xlu2 %792, %v154_v10   ;;  %217 = vperm.xlu0 %790, %v164_v11  }
  0x28   : > { %184 = vperm.xlu1 %791, %v153_v12   ;;  %461 = vmatpush.bf16.msra.mxu1 %v664_v56  ;;  %v802_v12 = vmov 1.0|1.0  }
  0x29   : > { %777 = vmatpush.bf16.msra.mxu3 %v664_v56  ;;  %403 = vmatpush.bf16.msra.mxu0 %v652_v60 }
  0x2a   : > { %770 = vmatpush.bf16.msra.mxu2 %v652_v60 }
  0x2c   : > { %462 = vmatpush.bf16.msra.mxu1 %v656_v0 }
  0x2d   : > { %778 = vmatpush.bf16.msra.mxu3 %v656_v0  ;;  %404 = vmatpush.bf16.msra.mxu0 %v644_v3 }
  0x2e   : > { %771 = vmatpush.bf16.msra.mxu2 %v644_v3 }
  0x2f   : > { %190 = vperm.xlu2 %792, %v155_v13   ;;  %220 = vperm.xlu0 %790, %v165_v14  }
  0x30   : > { %223 = vperm.xlu1 %791, %v166_v15   ;;  %463 = vmatpush.bf16.msra.mxu1 %v648_v4 }
  0x31   : > { %779 = vmatpush.bf16.msra.mxu3 %v648_v4 }
  0x37   : > { %229 = vperm.xlu2 %792, %v168_v16   ;;  %193 = vperm.xlu0 %790, %v156_v17  }
  0x38   : > { %226 = vperm.xlu1 %791, %v167_v18  }
  0x3f   : > { %196 = vperm.xlu0 %790, %v157_v19  }
  0x40   : > { %199 = vperm.xlu1 %791, %v158_v20  }
  0x69   : > { %v209_v11 = vpop.permute.xlu2 %208 }
  0x6a   : > { %vm243_vm6 = vcmp.eq.s32.totalorder %v209_v11, %v952_v8 }
  0x71   : > { %v212_v13 = vpop.permute.xlu2 %211 }
  0x72   : > { %vm244_vm7 = vcmp.eq.s32.totalorder %v212_v13, %v952_v8 }
  0x73   : > { %vm717_vm10 = vmpackc.low %vm244_vm7, %vm243_vm6 }
  0x79   : > { %v215_v16 = vpop.permute.xlu2 %214 }
  0x7a   : > { %vm245_vm14 = vcmp.eq.s32.totalorder %v215_v16, %v952_v8 }
  0x81   : > { %v203_v5 = vpop.permute.xlu0 %202  ;;  %v188_v19 = vpop.permute.xlu2 %187 }
  0x82   : > { %v173_v7 = vpop.permute.xlu1 %172  ;;  %vm241_vm0 = vcmp.eq.s32.totalorder %v203_v5, %v952_v8  ;;  %vm236_vm15 = vcmp.eq.s32.totalorder %v188_v19, %v952_v8 }
  0x83   : > { %vm231_vm2 = vcmp.eq.s32.totalorder %v173_v7, %v952_v8 }
  0x89   : > { %v206_v9 = vpop.permute.xlu0 %205  ;;  %v191_v23 = vpop.permute.xlu2 %190 }
  0x8a   : > { %vm242_vm1 = vcmp.eq.s32.totalorder %v206_v9, %v952_v8  ;;  %v176_v10 = vpop.permute.xlu1 %175 }
  0x8b   : > { %vm715_vm3 = vmpackc.low %vm242_vm1, %vm241_vm0  ;;  %vm232_vm4 = vcmp.eq.s32.totalorder %v176_v10, %v952_v8 }
  0x8c   : > { %vm705_vm5 = vmpackc.low %vm232_vm4, %vm231_vm2  ;;  %716 = vmatmul.msk.bf16.vlgmr.msra.gmra.mxu2 %vm715_vm3, %v802_v12  ;;  %736 = vmatmul.msk.bf16.vlgmr.msra.gmra.mxu3 %vm715_vm3, %v802_v12 }
  0x8d   : > { %706 = vmatmul.msk.bf16.vlgmr.msra.gmra.mxu0 %vm705_vm5, %v802_v12  ;;  %726 = vmatmul.msk.bf16.vlgmr.msra.gmra.mxu1 %vm705_vm5, %v802_v12  ;;  %vm237_vm5 = vcmp.eq.s32.totalorder %v191_v23, %v952_v8 }
  0x91   : > { %v179_v14 = vpop.permute.xlu0 %178  ;;  %v230_v27 = vpop.permute.xlu2 %229 }
  0x92   : > { %v182_v15 = vpop.permute.xlu1 %181  ;;  %vm233_vm8 = vcmp.eq.s32.totalorder %v179_v14, %v952_v8 }
  0x93   : > { %vm234_vm9 = vcmp.eq.s32.totalorder %v182_v15, %v952_v8 }
  0x94   : > { %vm707_vm11 = vmpackc.low %vm234_vm9, %vm233_vm8 }
  0x99   : > { %v218_v17 = vpop.permute.xlu0 %217 }
  0x9a   : > { %v185_v18 = vpop.permute.xlu1 %184  ;;  %vm246_vm12 = vcmp.eq.s32.totalorder %v218_v17, %v952_v8 }
  0x9b   : > { %vm235_vm13 = vcmp.eq.s32.totalorder %v185_v18, %v952_v8  ;;  %vm719_vm0 = vmpackc.low %vm246_vm12, %vm245_vm14 }
  0x9c   : > { %718 = vmatmul.msk.bf16.gmra.mxu2 %vm717_vm10, %v802_v12  ;;  %738 = vmatmul.msk.bf16.gmra.mxu3 %vm717_vm10, %v802_v12  ;;  %vm709_vm1 = vmpackc.low %vm236_vm15, %vm235_vm13 }
  0x9d   : > { %708 = vmatmul.msk.bf16.gmra.mxu0 %vm707_vm11, %v802_v12  ;;  %728 = vmatmul.msk.bf16.gmra.mxu1 %vm707_vm11, %v802_v12  ;;  %vm250_vm11 = vcmp.eq.s32.totalorder %v230_v27, %v952_v8 }
  0xa1   : > { %v221_v20 = vpop.permute.xlu0 %220 }
  0xa2   : > { %v224_v21 = vpop.permute.xlu1 %223  ;;  %vm247_vm2 = vcmp.eq.s32.totalorder %v221_v20, %v952_v8 }
  0xa3   : > { %vm248_vm3 = vcmp.eq.s32.totalorder %v224_v21, %v952_v8 }
  0xa4   : > { %vm721_vm6 = vmpackc.low %vm248_vm3, %vm247_vm2 }
  0xa9   : > { %v194_v22 = vpop.permute.xlu0 %193 }
  0xaa   : > { %vm238_vm4 = vcmp.eq.s32.totalorder %v194_v22, %v952_v8  ;;  %v227_v24 = vpop.permute.xlu1 %226 }
  0xab   : > { %vm711_vm7 = vmpackc.low %vm238_vm4, %vm237_vm5  ;;  %vm249_vm8 = vcmp.eq.s32.totalorder %v227_v24, %v952_v8 }
  0xac   : > { %720 = vmatmul.msk.bf16.gmra.mxu2 %vm719_vm0, %v802_v12  ;;  %740 = vmatmul.msk.bf16.gmra.mxu3 %vm719_vm0, %v802_v12  ;;  %vm723_vm12 = vmpackc.low %vm250_vm11, %vm249_vm8 }
  0xad   : > { %710 = vmatmul.msk.bf16.gmra.mxu0 %vm709_vm1, %v802_v12  ;;  %730 = vmatmul.msk.bf16.gmra.mxu1 %vm709_vm1, %v802_v12 }
  0xb1   : > { %v197_v25 = vpop.permute.xlu0 %196 }
  0xb2   : > { %v200_v26 = vpop.permute.xlu1 %199  ;;  %vm239_vm9 = vcmp.eq.s32.totalorder %v197_v25, %v952_v8 }
  0xb3   : > { %vm240_vm10 = vcmp.eq.s32.totalorder %v200_v26, %v952_v8 }
  0xb4   : > { %vm713_vm13 = vmpackc.low %vm240_vm10, %vm239_vm9 }
  0xbc   : > { %722 = vmatmul.msk.bf16.gmra.mxu2 %vm721_vm6, %v802_v12  ;;  %742 = vmatmul.msk.bf16.gmra.mxu3 %vm721_vm6, %v802_v12 }
  0xbd   : > { %712 = vmatmul.msk.bf16.gmra.mxu0 %vm711_vm7, %v802_v12  ;;  %732 = vmatmul.msk.bf16.gmra.mxu1 %vm711_vm7, %v802_v12 }
  0xcc   : > { %724 = vmatmul.msk.bf16.gmra.mxu2 %vm723_vm12, %v802_v12  ;;  %744 = vmatmul.msk.bf16.gmra.mxu3 %vm723_vm12, %v802_v12 }
  0xcd   : > { %714 = vmatmul.msk.bf16.gmra.mxu0 %vm713_vm13, %v802_v12  ;;  %734 = vmatmul.msk.bf16.gmra.mxu1 %vm713_vm13, %v802_v12 }
 0x10a   : > { %v406_v28 = vpop.f32.mrf.mxu0  ;;  %v465_v29 = vpop.f32.mrf.mxu1 }
 0x10b   : > { %v515_v30 = vpack.c.bf16 %v465_v29, %v406_v28 }
 0x10d   : > { %535 = vst [vmem:[%s979_s4] sm:$0xff] %v515_v30 }
 0x10f   : > { %v431_v31 = vpop.f32.mrf.mxu2  ;;  %v490_v32 = vpop.f32.mrf.mxu3 }
 0x110   : > { %v525_v33 = vpack.c.bf16 %v490_v32, %v431_v31 }
 0x112   : > { %545 = vst [vmem:[%s979_s4 + $0x50] sm:$0xff] %v525_v33  ;;  %v408_v34 = vpop.f32.mrf.mxu0  ;;  %v467_v35 = vpop.f32.mrf.mxu1 }
 0x113   : > { %v516_v36 = vpack.c.bf16 %v467_v35, %v408_v34 }
 0x115   : > { %536 = vst [vmem:[%s979_s4 + $0x8] sm:$0xff] %v516_v36 }
 0x117   : > { %v433_v37 = vpop.f32.mrf.mxu2  ;;  %v492_v38 = vpop.f32.mrf.mxu3 }
 0x118   : > { %v526_v39 = vpack.c.bf16 %v492_v38, %v433_v37 }
 0x11a   : > { %546 = vst [vmem:[%s979_s4 + $0x58] sm:$0xff] %v526_v39  ;;  %v411_v40 = vpop.f32.mrf.mxu0  ;;  %v470_v41 = vpop.f32.mrf.mxu1 }
 0x11b   : > { %v517_v42 = vpack.c.bf16 %v470_v41, %v411_v40 }
 0x11d   : > { %537 = vst [vmem:[%s979_s4 + $0x10] sm:$0xff] %v517_v42 }
 0x11f   : > { %v436_v43 = vpop.f32.mrf.mxu2  ;;  %v495_v44 = vpop.f32.mrf.mxu3 }
 0x120   : > { %v527_v45 = vpack.c.bf16 %v495_v44, %v436_v43 }
 0x122   : > { %547 = vst [vmem:[%s979_s4 + $0x60] sm:$0xff] %v527_v45  ;;  %v413_v46 = vpop.f32.mrf.mxu0  ;;  %v472_v47 = vpop.f32.mrf.mxu1 }
 0x123   : > { %v518_v48 = vpack.c.bf16 %v472_v47, %v413_v46 }
 0x125   : > { %538 = vst [vmem:[%s979_s4 + $0x18] sm:$0xff] %v518_v48 }
 0x127   : > { %v438_v49 = vpop.f32.mrf.mxu2  ;;  %v497_v50 = vpop.f32.mrf.mxu3 }
 0x128   : > { %v528_v51 = vpack.c.bf16 %v497_v50, %v438_v49 }
 0x12a   : > { %548 = vst [vmem:[%s979_s4 + $0x68] sm:$0xff] %v528_v51  ;;  %v416_v52 = vpop.f32.mrf.mxu0  ;;  %v475_v53 = vpop.f32.mrf.mxu1 }
 0x12b   : > { %v519_v54 = vpack.c.bf16 %v475_v53, %v416_v52 }
 0x12d   : > { %539 = vst [vmem:[%s979_s4 + $0x20] sm:$0xff] %v519_v54 }
 0x12f   : > { %v441_v55 = vpop.f32.mrf.mxu2  ;;  %v500_v56 = vpop.f32.mrf.mxu3 }
 0x130   : > { %v529_v57 = vpack.c.bf16 %v500_v56, %v441_v55 }
 0x132   : > { %549 = vst [vmem:[%s979_s4 + $0x70] sm:$0xff] %v529_v57  ;;  %v418_v58 = vpop.f32.mrf.mxu0  ;;  %v477_v59 = vpop.f32.mrf.mxu1 }
 0x133   : > { %v520_v60 = vpack.c.bf16 %v477_v59, %v418_v58 }
 0x135   : > { %540 = vst [vmem:[%s979_s4 + $0x28] sm:$0xff] %v520_v60 }
 0x137   : > { %v443_v61 = vpop.f32.mrf.mxu2  ;;  %v502_v62 = vpop.f32.mrf.mxu3 }
 0x138   : > { %v530_v63 = vpack.c.bf16 %v502_v62, %v443_v61 }
 0x13a   : > { %550 = vst [vmem:[%s979_s4 + $0x78] sm:$0xff] %v530_v63  ;;  %v421_v0 = vpop.f32.mrf.mxu0  ;;  %v480_v1 = vpop.f32.mrf.mxu1 }
 0x13b   : > { %v521_v2 = vpack.c.bf16 %v480_v1, %v421_v0 }
 0x13d   : > { %541 = vst [vmem:[%s979_s4 + $0x30] sm:$0xff] %v521_v2 }
 0x13f   : > { %v446_v3 = vpop.f32.mrf.mxu2  ;;  %v505_v4 = vpop.f32.mrf.mxu3 }
 0x140   : > { %v531_v5 = vpack.c.bf16 %v505_v4, %v446_v3 }
 0x142   : > { %551 = vst [vmem:[%s979_s4 + $0x80] sm:$0xff] %v531_v5  ;;  %v423_v6 = vpop.f32.mrf.mxu0  ;;  %v482_v7 = vpop.f32.mrf.mxu1 }
 0x143   : > { %v522_v8 = vpack.c.bf16 %v482_v7, %v423_v6 }
 0x145   : > { %542 = vst [vmem:[%s979_s4 + $0x38] sm:$0xff] %v522_v8 }
 0x147   : > { %v448_v9 = vpop.f32.mrf.mxu2  ;;  %v507_v10 = vpop.f32.mrf.mxu3 }
 0x148   : > { %v532_v11 = vpack.c.bf16 %v507_v10, %v448_v9 }
 0x14a   : > { %552 = vst [vmem:[%s979_s4 + $0x88] sm:$0xff] %v532_v11  ;;  %v426_v12 = vpop.f32.mrf.mxu0  ;;  %v485_v13 = vpop.f32.mrf.mxu1 }
 0x14b   : > { %v523_v14 = vpack.c.bf16 %v485_v13, %v426_v12 }
 0x14d   : > { %543 = vst [vmem:[%s979_s4 + $0x40] sm:$0xff] %v523_v14 }
 0x14f   : > { %v451_v15 = vpop.f32.mrf.mxu2  ;;  %v510_v16 = vpop.f32.mrf.mxu3 }
 0x150   : > { %v533_v17 = vpack.c.bf16 %v510_v16, %v451_v15 }
 0x152   : > { %553 = vst [vmem:[%s979_s4 + $0x90] sm:$0xff] %v533_v17  ;;  %v428_v18 = vpop.f32.mrf.mxu0  ;;  %v487_v19 = vpop.f32.mrf.mxu1 }
 0x153   : > { %v524_v20 = vpack.c.bf16 %v487_v19, %v428_v18 }
 0x155   : > { %544 = vst [vmem:[%s979_s4 + $0x48] sm:$0xff] %v524_v20 }
 0x157   : > { %v453_v21 = vpop.f32.mrf.mxu2  ;;  %v512_v22 = vpop.f32.mrf.mxu3 }
 0x158   : > { %v534_v23 = vpack.c.bf16 %v512_v22, %v453_v21 }
 0x15a   : > { %554 = vst [vmem:[%s979_s4 + $0x98] sm:$0xff] %v534_v23 }
 0x15b PF: > { %s12_s9 = sadd.s32 1, %s799_s9  }
 0x15c   : > { %p9_p4 = scmp.ge.s32.totalorder %s12_s9, 4  }
 0x15e   :  { %11 = sbr.rel (!%p9_p4) target bundleno = 1 (0x1), region = 58 }

</bundles_post_ra>
